<compile_context>
chip_gen: v7x
topology: tpu7x:2x2x1
jax: 0.10.0
libtpu: 0.0.40
codegen_flags: <defaults>
</compile_context>

<pallas_src>
import jax
import jax.numpy as jnp
from jax.experimental import pallas as pl
from jax.experimental.pallas import tpu as pltpu

_LANE = 128
_SUBLANE = 8
_X_TILE_BYTES = 2 * 1024 * 1024   # per-step x window; x2 for double buffering
_MAX_TILE_F = 512                 # feature-chunk cap (keeps the x window ~2 MiB)
_MAX_TILE_B = 64 * 1024


def _round_up(x: int, m: int) -> int:
    return -(-x // m) * m


def _linear_kernel(x_ref, w_ref, b_ref, o_ref):
    # x_ref: (TF, TB) f32 VMEM  -- batch on the lane axis (lane-dense)
    # w_ref: (TF, 1)  f32 VMEM  -- weight chunk for this feature tile
    # b_ref: (1, 1)   f32 SMEM  -- scalar bias
    # o_ref: (1, TB)  f32 VMEM  -- lane-dense output slab, resident accumulator
    @pl.when(pl.program_id(1) == 0)
    def _init():
        o_ref[...] = jnp.zeros_like(o_ref) + b_ref[0, 0]

    prod = x_ref[...] * w_ref[...]                        # VPU broadcast-multiply
    o_ref[...] += jnp.sum(prod, axis=0, keepdims=True)    # sublane reduce over TF


def linear_net_forward(x, weight, bias, *, tile_b=None, tile_f=None):
    """Forward pass of LinearNet (nn.Linear(n_feature, 1)).

    Args:
      x:      (batch, n_feature) float32
      weight: (1, n_feature)     float32  (PyTorch nn.Linear convention)
      bias:   (1,)               float32
      tile_b: optional batch-tile override  (multiple of 128 when batch > tile_b)
      tile_f: optional feature-tile override (multiple of 8 when n_feature > tile_f)
    Returns:
      y:      (batch, 1)         float32
    """
    batch, n_feature = x.shape
    x = x.astype(jnp.float32)
    w_col = weight.astype(jnp.float32).reshape(1, n_feature).T   # (F, 1)
    b2d = bias.astype(jnp.float32).reshape(1, 1)                 # (1, 1) SMEM scalar

    # ---- feature (reduction-axis) tiling ---------------------------------
    if tile_f is None:
        if n_feature <= _MAX_TILE_F:
            tile_f = n_feature
        else:
            nft = pl.cdiv(n_feature, _MAX_TILE_F)                # balance chunks
            tile_f = _round_up(pl.cdiv(n_feature, nft), _SUBLANE)
    else:
        tile_f = min(tile_f, n_feature)
        if tile_f < n_feature:
            tile_f = _round_up(tile_f, _SUBLANE)                 # (8,128) rule
            if tile_f >= n_feature:
                tile_f = n_feature
    f_pad = n_feature if tile_f == n_feature else _round_up(n_feature, tile_f)

    # ---- batch tiling -----------------------------------------------------
    if tile_b is None:
        tile_b = _X_TILE_BYTES // (4 * tile_f)
        tile_b = max(_LANE, (tile_b // _LANE) * _LANE)
        tile_b = min(tile_b, _MAX_TILE_B)
    if batch <= tile_b:
        tile_b = batch                    # single full-extent block, no padding
        b_pad = batch
    else:
        tile_b = max(_LANE, (tile_b // _LANE) * _LANE)
        b_pad = _round_up(batch, tile_b)

    # ---- lane-dense layout + zero padding (zeros contribute 0 to the sum) --
    x_t = x.T                                                    # (F, batch)
    if f_pad != n_feature or b_pad != batch:
        x_t = jnp.pad(x_t, ((0, f_pad - n_feature), (0, b_pad - batch)))
    if f_pad != n_feature:
        w_col = jnp.pad(w_col, ((0, f_pad - n_feature), (0, 0)))

    grid = (b_pad // tile_b, f_pad // tile_f)    # reduction axis last (convention)

    cost = pl.CostEstimate(
        flops=2 * batch * n_feature,
        bytes_accessed=4 * (f_pad * b_pad + f_pad + 1 + b_pad),
        transcendentals=0,
    )

    y_row = pl.pallas_call(
        _linear_kernel,
        out_shape=jax.ShapeDtypeStruct((1, b_pad), jnp.float32),
        grid_spec=pltpu.PrefetchScalarGridSpec(
            num_scalar_prefetch=0,
            grid=grid,
            in_specs=[
                # x streams a (tile_f, tile_b) window -> double-buffered DMA.
                pl.BlockSpec((tile_f, tile_b), lambda i, k: (k, i)),
                # weight chunk for this feature tile (tiny).
                pl.BlockSpec((tile_f, 1), lambda i, k: (k, 0)),
                # bias scalar lives in SMEM (no VMEM DMA / vreg broadcast).
                pl.BlockSpec(memory_space=pltpu.MemorySpace.SMEM),
            ],
            # Same out block for every k -> stays VMEM-resident as the
            # accumulator; written back to HBM once per batch tile.
            out_specs=pl.BlockSpec((1, tile_b), lambda i, k: (0, i)),
        ),
        compiler_params=pltpu.CompilerParams(
            dimension_semantics=("parallel", "arbitrary"),   # v7x shards batch tiles
        ),
        cost_estimate=cost,
    )(x_t, w_col, b2d)

    return y_row[:, :batch].T                                    # (batch, 1)


if __name__ == "__main__":
    key = jax.random.PRNGKey(0)
    k_x, k_w, k_b = jax.random.split(key, 3)

    # Small shapes matching the original linear-regression module.
    batch, n_feature = 8, 2
    x = jax.random.normal(k_x, (batch, n_feature), dtype=jnp.float32)
    weight = jax.random.normal(k_w, (1, n_feature), dtype=jnp.float32) * 0.01
    bias = jax.random.normal(k_b, (1,), dtype=jnp.float32) * 0.01

    y = jax.block_until_ready(linear_net_forward(x, weight, bias))
    y_ref = x @ weight.T + bias
    assert y.shape == (batch, 1)
    assert jnp.allclose(y, y_ref, atol=1e-5, rtol=1e-5), "mismatch vs reference (small)"

    # Multi-tile path: batch tiling + feature (reduction) tiling + remainder padding.
    k_x2, k_w2, k_b2 = jax.random.split(jax.random.PRNGKey(1), 3)
    batch2, f2 = 300, 20
    x2 = jax.random.normal(k_x2, (batch2, f2), dtype=jnp.float32)
    w2 = jax.random.normal(k_w2, (1, f2), dtype=jnp.float32) * 0.1
    b2 = jax.random.normal(k_b2, (1,), dtype=jnp.float32) * 0.1
    y2 = jax.block_until_ready(linear_net_forward(x2, w2, b2, tile_b=128, tile_f=8))
    y2_ref = x2 @ w2.T + b2
    assert y2.shape == (batch2, 1)
    assert jnp.allclose(y2, y2_ref, atol=1e-4, rtol=1e-4), "mismatch vs reference (tiled)"

    # Default auto-tiling with batch not a multiple of 128 / features not of 8.
    k_x3, k_w3, k_b3 = jax.random.split(jax.random.PRNGKey(2), 3)
    batch3, f3 = 1000, 3
    x3 = jax.random.normal(k_x3, (batch3, f3), dtype=jnp.float32)
    w3 = jax.random.normal(k_w3, (1, f3), dtype=jnp.float32) * 0.1
    b3 = jax.random.normal(k_b3, (1,), dtype=jnp.float32) * 0.1
    y3 = jax.block_until_ready(linear_net_forward(x3, w3, b3))
    y3_ref = x3 @ w3.T + b3
    assert y3.shape == (batch3, 1)
    assert jnp.allclose(y3, y3_ref, atol=1e-4, rtol=1e-4), "mismatch vs reference (auto)"

    print("KERNEL_OK")
</pallas_src>

<mosaic_0001>
module attributes {stable_mosaic.version = 11 : i64} {
  func.func @_linear_kernel(%arg0: i32, %arg1: i32, %arg2: memref<2x8xf32, #tpu.memory_space<vmem>>, %arg3: memref<2x1xf32, #tpu.memory_space<vmem>>, %arg4: memref<1x1xf32, #tpu.memory_space<smem>>, %arg5: memref<1x8xf32, #tpu.memory_space<vmem>>) attributes {dimension_semantics = [#tpu.dimension_semantics<parallel>, #tpu.dimension_semantics<arbitrary>], iteration_bounds = array<i64: 1, 1>, scalar_prefetch = 0 : i64, scratch_operands = 0 : i64, tpu.core_type = #tpu.core_type<tc>, window_params = [{transform_indices = @transform_0, window_bounds = array<i64: 2, 8>}, {transform_indices = @transform_1, window_bounds = array<i64: 2, 1>}, {transform_indices = @transform_2, window_bounds = array<i64: 1, 1>}, {transform_indices = @transform_3, window_bounds = array<i64: 1, 8>}]} {
    %c0_i32 = arith.constant 0 : i32
    %0 = arith.cmpi eq, %arg1, %c0_i32 : i32
    %1 = arith.extui %0 : i1 to i32
    %c0_i32_0 = arith.constant 0 : i32
    %2 = arith.cmpi ne, %1, %c0_i32_0 : i32
    scf.if %2 {
      %cst_8 = arith.constant 0.000000e+00 : f32
      %12 = vector.broadcast %cst_8 : f32 to vector<1x8xf32>
      %c0_9 = arith.constant 0 : index
      %c0_10 = arith.constant 0 : index
      %13 = memref.load %arg4[%c0_9, %c0_10] : memref<1x1xf32, #tpu.memory_space<smem>>
      %14 = vector.broadcast %13 : f32 to vector<1x8xf32>
      %15 = arith.addf %12, %14 : vector<1x8xf32>
      %c0_11 = arith.constant 0 : index
      %c0_12 = arith.constant 0 : index
      %16 = vector.load %arg5[%c0_11, %c0_12] : memref<1x8xf32, #tpu.memory_space<vmem>>, vector<1x8xf32>
      tpu.vector_store %arg5[%c0_11, %c0_12], %15 {strides = array<i32>} : memref<1x8xf32, #tpu.memory_space<vmem>>, vector<1x8xf32>,
    } else {
    }
    %c0 = arith.constant 0 : index
    %c0_1 = arith.constant 0 : index
    %3 = vector.load %arg2[%c0, %c0_1] : memref<2x8xf32, #tpu.memory_space<vmem>>, vector<2x8xf32>
    %c0_2 = arith.constant 0 : index
    %c0_3 = arith.constant 0 : index
    %4 = vector.load %arg3[%c0_2, %c0_3] : memref<2x1xf32, #tpu.memory_space<vmem>>, vector<2x1xf32>
    %5 = vector.broadcast %4 : vector<2x1xf32> to vector<2x8xf32>
    %6 = arith.mulf %3, %5 : vector<2x8xf32>
    %c0_4 = arith.constant 0 : index
    %c0_5 = arith.constant 0 : index
    %7 = vector.load %arg5[%c0_4, %c0_5] : memref<1x8xf32, #tpu.memory_space<vmem>>, vector<1x8xf32>
    %cst = arith.constant dense<0.000000e+00> : vector<8xf32>
    %8 = vector.multi_reduction <add>, %6, %cst [0] : vector<2x8xf32> to vector<8xf32>
    %9 = vector.shape_cast %8 : vector<8xf32> to vector<1x8xf32>
    %10 = arith.addf %7, %9 : vector<1x8xf32>
    %c0_6 = arith.constant 0 : index
    %c0_7 = arith.constant 0 : index
    %11 = vector.load %arg5[%c0_6, %c0_7] : memref<1x8xf32, #tpu.memory_space<vmem>>, vector<1x8xf32>
    tpu.vector_store %arg5[%c0_6, %c0_7], %10 {strides = array<i32>} : memref<1x8xf32, #tpu.memory_space<vmem>>, vector<1x8xf32>,
    return
  }
  func.func @transform_0(%arg0: i32, %arg1: i32) -> (i32, i32) {
    %c0_i32 = arith.constant 0 : i32
    return %arg1, %arg0 : i32, i32
  }
  func.func @transform_1(%arg0: i32, %arg1: i32) -> (i32, i32) {
    %c0_i32 = arith.constant 0 : i32
    %c0_i32_0 = arith.constant 0 : i32
    return %arg1, %c0_i32 : i32, i32
  }
  func.func @transform_2(%arg0: i32, %arg1: i32) -> (i32, i32) {
    %c0_i32 = arith.constant 0 : i32
    %c0_i32_0 = arith.constant 0 : i32
    %c0_i32_1 = arith.constant 0 : i32
    return %c0_i32, %c0_i32_0 : i32, i32
  }
  func.func @transform_3(%arg0: i32, %arg1: i32) -> (i32, i32) {
    %c0_i32 = arith.constant 0 : i32
    %c0_i32_0 = arith.constant 0 : i32
    return %c0_i32, %arg0 : i32, i32
  }
}

</mosaic_0001>

<bundles_post_ra>
// kernel: tpu_custom_call.1
= control target key start
LH: loop header
LB: loop body
LE: loop exit
PB: predicated region body
PF: predicated region fallthrough
CT: control target
= control target key end

     0   :  { %s131_s0 = inlined_call_operand.vmem [shape: f32[2,8], index: 0, kind: input, shape index: {}]   ;;  %s132_s1 = inlined_call_operand.vmem [shape: f32[2,1], index: 1, kind: input, shape index: {}]   ;;  %s133_s2 = inlined_call_operand.<no memory space> [shape: f32[1,1], index: 2, kind: input, shape index: {}]   ;;  %s134_s3 = inlined_call_operand.hbm [shape: f32[1,8], index: 3, kind: output, shape index: {}]  }
   0x1   :  { %v26_v0 = vld [vmem:[%s132_s1] sm:$0x3] }
   0x2   :  { %9 = vsyncpa [#allocation4], 0  ;;  %v86_v1 = vmov 0   ;;  %v21_v2 = vstv %s133_s2  ;;  %vm23_vm0 = vcmask 57344   ;;  %v25_v3 = vld [vmem:[%s131_s0] sm:$0x3] }
   0x3   :  { %61 = vset.pattern.permute.xlu0 %v86_v1  ;;  %24 = vst.msk [vmem:[#allocation3] sm:$0x1] %vm23_vm0, %v21_v2  ;;  %vm34_vm1 = vcmask 58368   ;;  %s87_s1 = smov [#allocation3]  }
   0x4   :  { %29 = vperm.xlu0 %61, %v26_v0   ;;  %s51_s18 = sshll.u32 %s87_s1, 4  ;;  %s52_s18 = int_to_ptr.vmem [resolvable:$true] %s51_s18 }
   0x5   :  { %s62_s2 = scalar_lea.vmem %s52_s18, 16  ;;  %s66_s0 = scalar_lea.vmem %s52_s18, 32 }
   0x6   :  { %p63_p0 = scmp.ne.s32.totalorder %s52_s18, %s62_s2  ;;  %p67_p1 = scmp.lt.s32.totalorder %s52_s18, %s52_s18 }
   0x7   :  { %p68_p2 = scmp.lt.s32.totalorder %s66_s0, %s62_s2 }
   0x9   :  { %p69_p3 = por %p68_p2, %p67_p1 }
   0xa   :  { %v33_v12 = vld [vmem:[#allocation3] sm:$0x1] }
   0xb   :  { %p70_p4 = pnand %p69_p3, %p63_p0 }
  0x83   :  { %v30_v4 = vpop.permute.xlu0 %29 }
  0x84   :  { %v32_v5 = vmul.f32 %v30_v4, %v25_v3 }
  0x86   :  { %v35_v6 = vsel %vm34_vm1, %v32_v5, 0.0 }
  0x87   :  { %v36_v7 = vrot.slane %v35_v6, 4 }
  0x89   :  { %v37_v8 = vadd.f32 %v36_v7, %v35_v6 }
  0x8b   :  { %v38_v9 = vrot.slane %v37_v8, 2 }
  0x8d   :  { %v39_v10 = vadd.f32 %v38_v9, %v37_v8 }
  0x8f   :  { %v40_v11 = vrot.slane %v39_v10, 1 }
  0x91   :  { %v41_v13 = vadd.f32 %v40_v11, %v39_v10 }
  0x93   :  { %v42_v14 = vadd.f32 %v41_v13, %v33_v12 }
  0x95   :  { %44 = vst.msk [vmem:[#allocation3] sm:$0x1] %vm23_vm0, %v42_v14 }
  0x96   :  { %73 = shalt.err (!%p70_p4)
}
  0x97   :  { %s74_s21 = scalar_lea.hbm %s134_s3, 16 }
  0x98   :  { %p75_p5 = scmp.ne.s32.totalorder %s134_s3, %s74_s21  ;;  %p78_p6 = scmp.lt.u32.totalorder %s74_s21, %s134_s3 }
  0x9a   :  { %p80_p7 = pnand %p78_p6, %p75_p5 }
  0x9c   :  { %83 = shalt.err (!%p80_p7)
}
  0x9d   :  { %54 = dma.vmem_to_hbm [thread:$0]  %s52_s18, 16, %s134_s3, [#allocation4]  }
  0x9e   :  { %84 = dma.done.wait [#allocation4], 16  }
  0x9f   :  { %85 = vsyncadd [#allocation4], 4294967280 }
  0xa0   :  { %58 = vsyncpa [#allocation4], 1 }

</bundles_post_ra>
